<compile_context>
chip_gen: v7x
topology: tpu7x:2x2x1
jax: 0.10.0
libtpu: 0.0.40
codegen_flags: <defaults>
</compile_context>

<pallas_src>
import functools

import jax
import jax.numpy as jnp
from jax import lax
from jax.experimental import pallas as pl
from jax.experimental.pallas import tpu as pltpu

_EPS = 1e-7


def _cac_partial_kernel(x_ref, y_ref, ym_ref, out_ref, *, m_rows):
    """Per-block partial sums for the CAC loss.

    x_ref, y_ref : (TR, 2T) block, [re, im] interleaved along lanes.
    ym_ref       : (TR, T) block of groundtruth magnitudes.
    out_ref      : (1, 8, 128) f32; sublanes 0-3 = num partial, 4-7 = den partial.
    """
    i = pl.program_id(0)
    tr, lanes2 = x_ref.shape

    x = x_ref[...].astype(jnp.float32)
    y = y_ref[...].astype(jnp.float32)
    d = x - y
    d2 = d * d

    # Pair adjacent lanes.  pltpu.roll matches jnp.roll (shift must be >= 0):
    # rolled[j] = d2[j-1], so odd lane 2k+1 of `pair` holds re_k^2 + im_k^2.
    pair = d2 + pltpu.roll(d2, shift=1, axis=1)
    clamped = jnp.maximum(pair, jnp.float32(_EPS))

    # Lane-parity mask at (1, 2T); sublane broadcast over rows is nearly free.
    lane = lax.broadcasted_iota(jnp.int32, (1, lanes2), 1)
    odd = (lane & 1) == 1

    ym = ym_ref[...].astype(jnp.float32)
    ym2 = ym * ym

    def _write(num_val, den_val):
        sub = lax.broadcasted_iota(jnp.int32, (8, 128), 0)
        out_ref[0] = jnp.where(sub < 4, num_val, den_val)

    def _full_sums():
        num_partial = jnp.sum(jnp.where(odd, clamped, 0.0))
        den_partial = jnp.sum(ym2)
        _write(num_partial, den_partial)

    if m_rows % tr == 0:
        # No ragged tail anywhere: pure fast path, no row masking at all.
        _full_sums()
    else:
        last = pl.num_programs(0) - 1

        @pl.when(i != last)
        def _():
            _full_sums()

        @pl.when(i == last)
        def _():
            # Cold path: mask padded rows (after the clamp, so padding -> exactly 0).
            row = lax.broadcasted_iota(jnp.int32, (tr, 1), 0)
            valid = (i * tr + row) < m_rows
            num_partial = jnp.sum(jnp.where(valid & odd, clamped, 0.0))
            den_partial = jnp.sum(jnp.where(valid, ym2, 0.0))
            _write(num_partial, den_partial)


def linear_scale_cac_loss(x_stft, y_stft, y_mag, *,
                          target_block_elems=256 * 1024,
                          vmem_limit_bytes=32 * 1024 * 1024):
    """Pallas implementation of _LinearScaleCACLoss.forward.

    Args:
        x_stft: (B, F, T, 2) predicted STFT (real/imag in last dim), f32 or bf16.
        y_stft: (B, F, T, 2) groundtruth STFT.
        y_mag:  (B, F, T)    groundtruth magnitude spectrogram.

    Returns:
        () float32 scalar loss.
    """
    B, F, T, C = x_stft.shape
    if C != 2:
        raise ValueError("last dim of x_stft/y_stft must be [real, imag]")
    if y_stft.shape != x_stft.shape or y_mag.shape != (B, F, T):
        raise ValueError("shape mismatch between x_stft / y_stft / y_mag")

    M = B * F
    # Free contiguous reshapes: real/imag stay interleaved along the lane axis.
    xf = x_stft.reshape(M, 2 * T)
    yf = y_stft.reshape(M, 2 * T)
    ym = y_mag.reshape(M, T)

    # Rows per block: multiple of 32 (bf16/int8 tile friendly), sized so
    # double-buffered inputs + bounded temporaries fit 32 MiB even on v7x.
    rows_budget = max(32, (target_block_elems // max(T, 1)) // 32 * 32)
    tr = min((M + 31) // 32 * 32, rows_budget)
    g = pl.cdiv(M, tr)

    kernel = functools.partial(_cac_partial_kernel, m_rows=M)

    partials = pl.pallas_call(
        kernel,
        out_shape=jax.ShapeDtypeStruct((g, 8, 128), jnp.float32),
        grid=(g,),
        in_specs=[
            pl.BlockSpec((tr, 2 * T), lambda i: (i, 0)),
            pl.BlockSpec((tr, 2 * T), lambda i: (i, 0)),
            pl.BlockSpec((tr, T), lambda i: (i, 0)),
        ],
        out_specs=pl.BlockSpec((1, 8, 128), lambda i: (i, 0, 0)),
        compiler_params=pltpu.CompilerParams(
            dimension_semantics=("parallel",),   # stateless grid -> megacore OK
            vmem_limit_bytes=vmem_limit_bytes,
        ),
    )(xf, yf, ym)

    num = jnp.sum(partials[:, 0, 0])
    den = jnp.sum(partials[:, 4, 0])
    return jnp.sqrt(num) / jnp.sqrt(den)


def _reference_loss(x_stft, y_stft, y_mag):
    dif = x_stft.astype(jnp.float32) - y_stft.astype(jnp.float32)
    dif_mag = jnp.sqrt(jnp.maximum(dif[..., 0] ** 2 + dif[..., 1] ** 2, 1e-7))
    return jnp.sqrt(jnp.sum(dif_mag ** 2)) / jnp.sqrt(
        jnp.sum(y_mag.astype(jnp.float32) ** 2))


if __name__ == "__main__":
    key = jax.random.PRNGKey(0)
    k1, k2, k3 = jax.random.split(key, 3)

    # Small STFT-like shapes: F = n_fft//2 + 1 is odd, so B*F = 66 is not a
    # multiple of the row block (exercises the cold-path tail masking); T = 64
    # gives a 128-wide lane dim.
    B, F, T = 2, 33, 64
    x_stft = jax.random.normal(k1, (B, F, T, 2), dtype=jnp.float32)
    y_stft = jax.random.normal(k2, (B, F, T, 2), dtype=jnp.float32)
    y_mag = jnp.abs(jax.random.normal(k3, (B, F, T), dtype=jnp.float32)) + 0.1

    loss = linear_scale_cac_loss(x_stft, y_stft, y_mag)
    jax.block_until_ready(loss)

    ref = _reference_loss(x_stft, y_stft, y_mag)
    assert jnp.allclose(loss, ref, rtol=1e-5, atol=1e-6), (loss, ref)

    print("KERNEL_OK")
</pallas_src>

<mosaic_0001>
module attributes {stable_mosaic.version = 11 : i64} {
  func.func @_cac_partial_kernel(%arg0: i32, %arg1: memref<96x128xf32, #tpu.memory_space<vmem>>, %arg2: memref<96x128xf32, #tpu.memory_space<vmem>>, %arg3: memref<96x64xf32, #tpu.memory_space<vmem>>, %arg4: memref<1x8x128xf32, #tpu.memory_space<vmem>>) attributes {dimension_semantics = [#tpu.dimension_semantics<parallel>], iteration_bounds = array<i64: 1>, scalar_prefetch = 0 : i64, scratch_operands = 0 : i64, tpu.core_type = #tpu.core_type<tc>, window_params = [{transform_indices = @transform_0, window_bounds = array<i64: 96, 128>}, {transform_indices = @transform_1, window_bounds = array<i64: 96, 128>}, {transform_indices = @transform_2, window_bounds = array<i64: 96, 64>}, {transform_indices = @transform_3, window_bounds = array<i64: 1, 8, 128>}]} {
    %c0 = arith.constant 0 : index
    %c0_0 = arith.constant 0 : index
    %0 = vector.load %arg1[%c0, %c0_0] : memref<96x128xf32, #tpu.memory_space<vmem>>, vector<96x128xf32>
    %c0_1 = arith.constant 0 : index
    %c0_2 = arith.constant 0 : index
    %1 = vector.load %arg2[%c0_1, %c0_2] : memref<96x128xf32, #tpu.memory_space<vmem>>, vector<96x128xf32>
    %2 = arith.subf %0, %1 : vector<96x128xf32>
    %3 = arith.mulf %2, %2 : vector<96x128xf32>
    %c1_i32 = arith.constant 1 : i32
    %4 = tpu.dynamic_rotate %3 by %c1_i32 dim 1 : vector<96x128xf32>, i32 -> vector<96x128xf32>
    %5 = arith.addf %3, %4 : vector<96x128xf32>
    %cst = arith.constant 1.000000e-07 : f32
    %6 = vector.broadcast %cst : f32 to vector<96x128xf32>
    %7 = arith.maximumf %5, %6 : vector<96x128xf32>
    %8 = tpu.iota {dimensions = array<i32: 1>} : vector<1x128xi32>
    %c1_i32_3 = arith.constant 1 : i32
    %9 = vector.broadcast %c1_i32_3 : i32 to vector<1x128xi32>
    %10 = arith.andi %8, %9 : vector<1x128xi32>
    %c1_i32_4 = arith.constant 1 : i32
    %11 = vector.broadcast %c1_i32_4 : i32 to vector<1x128xi32>
    %12 = arith.cmpi eq, %10, %11 : vector<1x128xi32>
    %c0_5 = arith.constant 0 : index
    %c0_6 = arith.constant 0 : index
    %13 = vector.load %arg3[%c0_5, %c0_6] : memref<96x64xf32, #tpu.memory_space<vmem>>, vector<96x64xf32>
    %14 = arith.mulf %13, %13 : vector<96x64xf32>
    %c0_i32 = arith.constant 0 : i32
    %15 = arith.cmpi ne, %arg0, %c0_i32 : i32
    %16 = arith.extui %15 : i1 to i32
    %c0_i32_7 = arith.constant 0 : i32
    %17 = arith.cmpi ne, %16, %c0_i32_7 : i32
    scf.if %17 {
      %cst_10 = arith.constant 0.000000e+00 : f32
      %21 = vector.shape_cast %12 : vector<1x128xi1> to vector<1x128xi1>
      %22 = vector.broadcast %21 : vector<1x128xi1> to vector<96x128xi1>
      %23 = vector.broadcast %cst_10 : f32 to vector<96x128xf32>
      %24 = arith.select %22, %7, %23 : vector<96x128xi1>, vector<96x128xf32>
      %25 = vector.shape_cast %24 : vector<96x128xf32> to vector<1x96x128xf32>
      %cst_11 = arith.constant dense<0.000000e+00> : vector<1xf32>
      %26 = vector.multi_reduction <add>, %25, %cst_11 [1, 2] : vector<1x96x128xf32> to vector<1xf32>
      %27 = vector.shape_cast %26 : vector<1xf32> to vector<1x1x1xf32>
      %28 = vector.extract %27[0, 0, 0] : f32 from vector<1x1x1xf32>
      %29 = vector.shape_cast %14 : vector<96x64xf32> to vector<1x96x64xf32>
      %cst_12 = arith.constant dense<0.000000e+00> : vector<1xf32>
      %30 = vector.multi_reduction <add>, %29, %cst_12 [1, 2] : vector<1x96x64xf32> to vector<1xf32>
      %31 = vector.shape_cast %30 : vector<1xf32> to vector<1x1x1xf32>
      %32 = vector.extract %31[0, 0, 0] : f32 from vector<1x1x1xf32>
      %33 = tpu.iota {dimensions = array<i32: 0>} : vector<8x128xi32>
      %c4_i32 = arith.constant 4 : i32
      %34 = vector.broadcast %c4_i32 : i32 to vector<8x128xi32>
      %35 = arith.cmpi slt, %33, %34 : vector<8x128xi32>
      %36 = vector.broadcast %28 : f32 to vector<8x128xf32>
      %37 = vector.broadcast %32 : f32 to vector<8x128xf32>
      %38 = arith.select %35, %36, %37 : vector<8x128xi1>, vector<8x128xf32>
      %c0_13 = arith.constant 0 : index
      %c0_14 = arith.constant 0 : index
      %c0_15 = arith.constant 0 : index
      %39 = vector.load %arg4[%c0_13, %c0_14, %c0_15] : memref<1x8x128xf32, #tpu.memory_space<vmem>>, vector<1x8x128xf32>
      %40 = vector.shape_cast %39 : vector<1x8x128xf32> to vector<8x128xf32>
      %41 = vector.shape_cast %38 : vector<8x128xf32> to vector<1x8x128xf32>
      tpu.vector_store %arg4[%c0_13, %c0_14, %c0_15], %41 {strides = array<i32>} : memref<1x8x128xf32, #tpu.memory_space<vmem>>, vector<1x8x128xf32>,
    } else {
    }
    %c0_i32_8 = arith.constant 0 : i32
    %18 = arith.cmpi eq, %arg0, %c0_i32_8 : i32
    %19 = arith.extui %18 : i1 to i32
    %c0_i32_9 = arith.constant 0 : i32
    %20 = arith.cmpi ne, %19, %c0_i32_9 : i32
    scf.if %20 {
      %21 = tpu.iota {dimensions = array<i32: 0>} : vector<96x1xi32>
      %c96_i32 = arith.constant 96 : i32
      %22 = arith.muli %arg0, %c96_i32 : i32
      %23 = vector.broadcast %22 : i32 to vector<96x1xi32>
      %24 = arith.addi %23, %21 : vector<96x1xi32>
      %c66_i32 = arith.constant 66 : i32
      %25 = vector.broadcast %c66_i32 : i32 to vector<96x1xi32>
      %26 = arith.cmpi slt, %24, %25 : vector<96x1xi32>
      %27 = vector.broadcast %26 : vector<96x1xi1> to vector<96x128xi1>
      %28 = vector.broadcast %12 : vector<1x128xi1> to vector<96x128xi1>
      %29 = arith.andi %27, %28 : vector<96x128xi1>
      %cst_10 = arith.constant 0.000000e+00 : f32
      %30 = vector.broadcast %cst_10 : f32 to vector<96x128xf32>
      %31 = arith.select %29, %7, %30 : vector<96x128xi1>, vector<96x128xf32>
      %32 = vector.shape_cast %31 : vector<96x128xf32> to vector<1x96x128xf32>
      %cst_11 = arith.constant dense<0.000000e+00> : vector<1xf32>
      %33 = vector.multi_reduction <add>, %32, %cst_11 [1, 2] : vector<1x96x128xf32> to vector<1xf32>
      %34 = vector.shape_cast %33 : vector<1xf32> to vector<1x1x1xf32>
      %35 = vector.extract %34[0, 0, 0] : f32 from vector<1x1x1xf32>
      %cst_12 = arith.constant 0.000000e+00 : f32
      %36 = vector.shape_cast %26 : vector<96x1xi1> to vector<96x1xi1>
      %37 = vector.broadcast %36 : vector<96x1xi1> to vector<96x64xi1>
      %38 = vector.broadcast %cst_12 : f32 to vector<96x64xf32>
      %39 = arith.select %37, %14, %38 : vector<96x64xi1>, vector<96x64xf32>
      %40 = vector.shape_cast %39 : vector<96x64xf32> to vector<1x96x64xf32>
      %cst_13 = arith.constant dense<0.000000e+00> : vector<1xf32>
      %41 = vector.multi_reduction <add>, %40, %cst_13 [1, 2] : vector<1x96x64xf32> to vector<1xf32>
      %42 = vector.shape_cast %41 : vector<1xf32> to vector<1x1x1xf32>
      %43 = vector.extract %42[0, 0, 0] : f32 from vector<1x1x1xf32>
      %44 = tpu.iota {dimensions = array<i32: 0>} : vector<8x128xi32>
      %c4_i32 = arith.constant 4 : i32
      %45 = vector.broadcast %c4_i32 : i32 to vector<8x128xi32>
      %46 = arith.cmpi slt, %44, %45 : vector<8x128xi32>
      %47 = vector.broadcast %35 : f32 to vector<8x128xf32>
      %48 = vector.broadcast %43 : f32 to vector<8x128xf32>
      %49 = arith.select %46, %47, %48 : vector<8x128xi1>, vector<8x128xf32>
      %c0_14 = arith.constant 0 : index
      %c0_15 = arith.constant 0 : index
      %c0_16 = arith.constant 0 : index
      %50 = vector.load %arg4[%c0_14, %c0_15, %c0_16] : memref<1x8x128xf32, #tpu.memory_space<vmem>>, vector<1x8x128xf32>
      %51 = vector.shape_cast %50 : vector<1x8x128xf32> to vector<8x128xf32>
      %52 = vector.shape_cast %49 : vector<8x128xf32> to vector<1x8x128xf32>
      tpu.vector_store %arg4[%c0_14, %c0_15, %c0_16], %52 {strides = array<i32>} : memref<1x8x128xf32, #tpu.memory_space<vmem>>, vector<1x8x128xf32>,
    } else {
    }
    return
  }
  func.func @transform_0(%arg0: i32) -> (i32, i32) {
    %c0_i32 = arith.constant 0 : i32
    %c0_i32_0 = arith.constant 0 : i32
    return %arg0, %c0_i32 : i32, i32
  }
  func.func @transform_1(%arg0: i32) -> (i32, i32) {
    %c0_i32 = arith.constant 0 : i32
    %c0_i32_0 = arith.constant 0 : i32
    return %arg0, %c0_i32 : i32, i32
  }
  func.func @transform_2(%arg0: i32) -> (i32, i32) {
    %c0_i32 = arith.constant 0 : i32
    %c0_i32_0 = arith.constant 0 : i32
    return %arg0, %c0_i32 : i32, i32
  }
  func.func @transform_3(%arg0: i32) -> (i32, i32, i32) {
    %c0_i32 = arith.constant 0 : i32
    %c0_i32_0 = arith.constant 0 : i32
    %c0_i32_1 = arith.constant 0 : i32
    return %arg0, %c0_i32, %c0_i32_0 : i32, i32, i32
  }
}

</mosaic_0001>

<bundles_post_ra>
// kernel: tpu_custom_call.1
= control target key start
LH: loop header
LB: loop body
LE: loop exit
PB: predicated region body
PF: predicated region fallthrough
CT: control target
= control target key end

     0   :  { %8 = vsyncpa [#allocation3], 0  ;;  %s657_s0 = inlined_call_operand.vmem [shape: f32[66,128], index: 0, kind: input, shape index: {}]   ;;  %s658_s1 = inlined_call_operand.hbm [shape: f32[66,128], index: 1, kind: input, shape index: {}]   ;;  %s659_s2 = inlined_call_operand.vmem [shape: f32[66,64], index: 2, kind: input, shape index: {}]   ;;  %s660_s3 = inlined_call_operand.hbm [shape: f32[1,8,128], index: 3, kind: output, shape index: {}]  }
   0x1   :  { %9 = vsyncpa [#allocation4], 0 }
   0x2   :  { %16 = vsyncadd [#allocation3], 384  ;;  %s466_s12 = smov [#allocation2]   ;;  %s418_s16 = scalar_lea.hbm %s658_s1, 1152 }
   0x3   :  { %s17_s13 = sshll.u32 %s466_s12, 4  ;;  %p419_p0 = scmp.ne.s32.totalorder %s658_s1, %s418_s16  ;;  %s18_s13 = int_to_ptr.vmem [resolvable:$true] %s17_s13 }
   0x4   :  { %p422_p1 = scmp.lt.u32.totalorder %s418_s16, %s658_s1 }
   0x6   :  { %p424_p2 = pnand %p422_p1, %p419_p0 }
   0x8   :  { %427 = shalt.err (!%p424_p2)
}
   0x9   :  { %s428_s21 = scalar_lea.vmem %s18_s13, 1152  ;;  %s432_s22 = scalar_lea.vmem %s18_s13, 1536 }
   0xa   :  { %p429_p3 = scmp.ne.s32.totalorder %s18_s13, %s428_s21  ;;  %p433_p4 = scmp.lt.s32.totalorder %s18_s13, %s18_s13 }
   0xb   :  { %p434_p5 = scmp.lt.s32.totalorder %s432_s22, %s428_s21 }
   0xd   :  { %p435_p6 = por %p434_p5, %p433_p4 }
   0xf   :  { %p436_p7 = pnand %p435_p6, %p429_p3 }
  0x11   :  { %439 = shalt.err (!%p436_p7)
}
  0x12   :  { %s467_s23 = smov 128   ;;  %s468_s24 = smov 8  }
  0x13   :  { %23 = dma.hbm_to_vmem [thread:$0]  %s658_s1, 1152, %s18_s13, [#allocation3], %s467_s23, %s467_s23, %s468_s24  }
  0x14   :  { %462 = dma.done.wait [#allocation3], 1536  }
  0x15   :  { %463 = vsyncadd [#allocation3], 4294965760  ;;  %v125_v0 = vlaneseq  ;;  %v29_v1 = vld [vmem:[%s657_s0] sm:$0xff]  ;;  %v31_v3 = vld [vmem:[%s657_s0 + $0x10] sm:$0xff]  ;;  %s469_s11 = smov 1   ;;  %vm356_vm3 = vcmask 523264  }
  0x16   :  { %v41_v2 = vld [vmem:[#allocation2] sm:$0xff]  ;;  %v43_v5 = vld [vmem:[#allocation2 + $0x10] sm:$0xff]  ;;  %v30_v6 = vld [vmem:[%s657_s0 + $0x8] sm:$0xff] }
  0x17   :  { %v53_v4 = vsub.f32 %v29_v1, %v41_v2  ;;  %v42_v7 = vld [vmem:[#allocation2 + $0x8] sm:$0xff]  ;;  %v55_v8 = vsub.f32 %v31_v3, %v43_v5  ;;  %v32_v10 = vld [vmem:[%s657_s0 + $0x18] sm:$0xff]  ;;  %v33_v12 = vld [vmem:[%s657_s0 + $0x20] sm:$0xff]  ;;  %v126_v13 = vand.u32 127, %v125_v0  ;;  %v518_v14 = vshrl.u32 %v125_v0, 7 }
  0x18   :  { %v54_v9 = vsub.f32 %v30_v6, %v42_v7  ;;  %v44_v11 = vld [vmem:[#allocation2 + $0x18] sm:$0xff]  ;;  %v45_v17 = vld [vmem:[#allocation2 + $0x20] sm:$0xff]  ;;  %v34_v18 = vld [vmem:[%s657_s0 + $0x28] sm:$0xff] }
  0x19   :  { %v520_v15 = vmul.f32 %v53_v4, %v53_v4  ;;  %v56_v16 = vsub.f32 %v32_v10, %v44_v11  ;;  %v46_v19 = vld [vmem:[#allocation2 + $0x28] sm:$0xff]  ;;  %v525_v20 = vmul.f32 %v55_v8, %v55_v8  ;;  %v57_v22 = vsub.f32 %v33_v12, %v45_v17  ;;  %v35_v25 = vld [vmem:[%s657_s0 + $0x30] sm:$0xff]  ;;  %v36_v29 = vld [vmem:[%s657_s0 + $0x38] sm:$0xff] }
  0x1a   :  { %v529_v21 = vmul.f32 %v54_v9, %v54_v9  ;;  %v58_v24 = vsub.f32 %v34_v18, %v46_v19  ;;  %v47_v26 = vld [vmem:[#allocation2 + $0x30] sm:$0xff]  ;;  %v127_v27 = vand.u32 1, %v126_v13  ;;  %v244_v28 = vadd.s32 64, %v518_v14  ;;  %v48_v30 = vld [vmem:[#allocation2 + $0x38] sm:$0xff]  ;;  %v37_v33 = vld [vmem:[%s657_s0 + $0x40] sm:$0xff] }
  0x1b   :  { %77 = vrot.lane.b32.xlu0 %v520_v15, %s469_s11  ;;  %81 = vrot.lane.b32.xlu1 %v525_v20, %s469_s11  ;;  %v533_v23 = vmul.f32 %v56_v16, %v56_v16  ;;  %v544_v31 = vmul.f32 %v57_v22, %v57_v22  ;;  %v59_v32 = vsub.f32 %v35_v25, %v47_v26  ;;  %v49_v36 = vld [vmem:[#allocation2 + $0x40] sm:$0xff]  ;;  %v130_v39 = vld [vmem:[%s659_s2 + $0x8] sm:$0xff]  ;;  %v131_v46 = vld [vmem:[%s659_s2 + $0x10] sm:$0xff]  ;;  %vm389_vm4 = vcmp.lt.s32.totalorder %v518_v14, 4 }
  0x1c   :  { %v551_v34 = vmul.f32 %v58_v24, %v58_v24  ;;  %v60_v35 = vsub.f32 %v36_v29, %v48_v30  ;;  %vm553_vm0 = vcmp.eq.s32.totalorder %v127_v27, 1  ;;  %v129_v38 = vld [vmem:[%s659_s2] sm:$0xff]  ;;  %vm270_vm1 = vcmp.lt.s32.totalorder %v244_v28, 66  ;;  %v132_v51 = vld [vmem:[%s659_s2 + $0x18] sm:$0xff]  ;;  %v134_v59 = vld [vmem:[%s659_s2 + $0x28] sm:$0xff] }
  0x1d   :  { %vm566_vm2 = vmand %vm270_vm1, %vm553_vm0  ;;  %v572_v41 = vmul.f32 %v59_v32, %v59_v32  ;;  %v61_v42 = vsub.f32 %v37_v33, %v49_v36  ;;  %v141_v43 = vmul.f32 %v129_v38, %v129_v38  ;;  %v142_v44 = vmul.f32 %v130_v39, %v130_v39  ;;  %v133_v55 = vld [vmem:[%s659_s2 + $0x20] sm:$0xff]  ;;  %v135_v63 = vld [vmem:[%s659_s2 + $0x30] sm:$0xff] }
  0x1e   :  { %v576_v45 = vmul.f32 %v60_v35, %v60_v35  ;;  %v143_v48 = vmul.f32 %v131_v46, %v131_v46  ;;  %v144_v53 = vmul.f32 %v132_v51, %v132_v51  ;;  %v145_v57 = vmul.f32 %v133_v55, %v133_v55  ;;  %v136_v3 = vld [vmem:[%s659_s2 + $0x38] sm:$0xff]  ;;  %v137_v4 = vld [vmem:[%s659_s2 + $0x40] sm:$0xff]  ;;  %s470_s2 = smov [#allocation5]  }
  0x1f   :  { %79 = vrot.lane.b32.xlu0 %v529_v21, %s469_s11  ;;  %83 = vrot.lane.b32.xlu1 %v533_v23, %s469_s11  ;;  %v583_v47 = vmul.f32 %v61_v42, %v61_v42  ;;  %v357_v49 = vsel %vm356_vm3, %v141_v43, 0.0  ;;  %v358_v50 = vsel %vm356_vm3, %v142_v44, 0.0  ;;  %v146_v61 = vmul.f32 %v134_v59, %v134_v59  ;;  %s400_s7 = sshll.u32 %s470_s2, 4  ;;  %s401_s7 = int_to_ptr.vmem [resolvable:$true] %s400_s7 }
  0x20   :  { %v359_v52 = vadd.f32 %v358_v50, %v357_v49  ;;  %v360_v54 = vsel %vm356_vm3, %v143_v48, 0.0  ;;  %v362_v58 = vsel %vm356_vm3, %v144_v53, 0.0  ;;  %v364_v62 = vsel %vm356_vm3, %v145_v57, 0.0  ;;  %s440_s10 = scalar_lea.vmem %s401_s7, 128  ;;  %p445_p9 = scmp.lt.s32.totalorder %s401_s7, %s401_s7 }
  0x21   :  { %v147_v1 = vmul.f32 %v135_v63, %v135_v63  ;;  %v366_v2 = vsel %vm356_vm3, %v146_v61, 0.0  ;;  %v148_v6 = vmul.f32 %v136_v3, %v136_v3  ;;  %v149_v8 = vmul.f32 %v137_v4, %v137_v4  ;;  %p441_p8 = scmp.ne.s32.totalorder %s401_s7, %s440_s10  ;;  %p446_p10 = scmp.lt.s32.totalorder %s440_s10, %s440_s10 }
  0x22   :  { %v361_v56 = vadd.f32 %v360_v54, %v359_v52 }
  0x23   :  { %85 = vrot.lane.b32.xlu0 %v544_v31, %s469_s11  ;;  %87 = vrot.lane.b32.xlu1 %v551_v34, %s469_s11  ;;  %v368_v7 = vsel %vm356_vm3, %v147_v1, 0.0  ;;  %v370_v10 = vsel %vm356_vm3, %v148_v6, 0.0  ;;  %v352_v11 = vsel %vm270_vm1, %v149_v8, 0.0  ;;  %p447_p11 = por %p446_p10, %p445_p9 }
  0x24   :  { %v363_v60 = vadd.f32 %v362_v58, %v361_v56  ;;  %v372_v13 = vsel %vm356_vm3, %v352_v11, 0.0 }
  0x25   :  { %p448_p12 = pnand %p447_p11, %p441_p8 }
  0x26   :  { %v365_v0 = vadd.f32 %v364_v62, %v363_v60 }
  0x27   :  { %89 = vrot.lane.b32.xlu0 %v572_v41, %s469_s11  ;;  %91 = vrot.lane.b32.xlu1 %v576_v45, %s469_s11 }
  0x28   :  { %v367_v5 = vadd.f32 %v366_v2, %v365_v0 }
  0x2a   :  { %v369_v9 = vadd.f32 %v368_v7, %v367_v5 }
  0x2b   :  { %93 = vrot.lane.b32.xlu0 %v583_v47, %s469_s11 }
  0x2c   :  { %v371_v12 = vadd.f32 %v370_v10, %v369_v9 }
  0x2e   :  { %v373_v16 = vadd.f32 %v372_v13, %v371_v12 }
  0x4a   :  { %380 = vadd.xlane.f32.xlu0 %v373_v16 }
  0x8d   :  { %v78_v17 = vpop.permute.xlu0 %77  ;;  %v82_v19 = vpop.permute.xlu1 %81 }
  0x8e   :  { %v101_v18 = vadd.f32 %v78_v17, %v520_v15  ;;  %v103_v22 = vadd.f32 %v82_v19, %v525_v20 }
  0x90   :  { %v113_v25 = vmax.f32 %v101_v18, 1e-07  ;;  %v115_v28 = vmax.f32 %v103_v22, 1e-07 }
  0x91   :  { %v80_v24 = vpop.permute.xlu0 %79  ;;  %v84_v27 = vpop.permute.xlu1 %83 }
  0x92   :  { %v102_v26 = vadd.f32 %v80_v24, %v529_v21  ;;  %v104_v29 = vadd.f32 %v84_v27, %v533_v23  ;;  %v312_v35 = vsel %vm553_vm0, %v113_v25, 0.0  ;;  %v314_v21 = vsel %vm553_vm0, %v115_v28, 0.0 }
  0x94   :  { %v114_v30 = vmax.f32 %v102_v26, 1e-07  ;;  %v116_v32 = vmax.f32 %v104_v29, 1e-07 }
  0x95   :  { %v86_v33 = vpop.permute.xlu0 %85  ;;  %v88_v20 = vpop.permute.xlu1 %87 }
  0x96   :  { %v313_v15 = vsel %vm553_vm0, %v114_v30, 0.0  ;;  %v105_v36 = vadd.f32 %v86_v33, %v544_v31  ;;  %v106_v39 = vadd.f32 %v88_v20, %v551_v34  ;;  %v315_v23 = vsel %vm553_vm0, %v116_v32, 0.0 }
  0x97   :  { %v324_v38 = vadd.f32 %v313_v15, %v312_v35 }
  0x98   :  { %v117_v42 = vmax.f32 %v105_v36, 1e-07  ;;  %v118_v44 = vmax.f32 %v106_v39, 1e-07 }
  0x99   :  { %v325_v43 = vadd.f32 %v324_v38, %v314_v21  ;;  %v90_v46 = vpop.permute.xlu0 %89  ;;  %v92_v31 = vpop.permute.xlu1 %91 }
  0x9a   :  { %v316_v48 = vsel %vm553_vm0, %v117_v42, 0.0  ;;  %v107_v49 = vadd.f32 %v90_v46, %v572_v41  ;;  %v108_v51 = vadd.f32 %v92_v31, %v576_v45  ;;  %v317_v34 = vsel %vm553_vm0, %v118_v44, 0.0 }
  0x9b   :  { %v326_v50 = vadd.f32 %v325_v43, %v315_v23 }
  0x9c   :  { %v119_v52 = vmax.f32 %v107_v49, 1e-07  ;;  %v120_v54 = vmax.f32 %v108_v51, 1e-07 }
  0x9d   :  { %v327_v53 = vadd.f32 %v326_v50, %v316_v48  ;;  %v94_v55 = vpop.permute.xlu0 %93 }
  0x9e   :  { %v318_v56 = vsel %vm553_vm0, %v119_v52, 0.0  ;;  %v109_v57 = vadd.f32 %v94_v55, %v583_v47  ;;  %v319_v41 = vsel %vm553_vm0, %v120_v54, 0.0 }
  0x9f   :  { %v328_v58 = vadd.f32 %v327_v53, %v317_v34 }
  0xa0   :  { %v121_v59 = vmax.f32 %v109_v57, 1e-07 }
  0xa1   :  { %v329_v60 = vadd.f32 %v328_v58, %v318_v56 }
  0xa2   :  { %v320_v45 = vsel %vm566_vm2, %v121_v59, 0.0 }
  0xa3   :  { %v330_v61 = vadd.f32 %v329_v60, %v319_v41 }
  0xa5   :  { %v331_v62 = vadd.f32 %v330_v61, %v320_v45 }
  0xa7   :  { %335 = vadd.xlane.f32.xlu1 %v331_v62 }
  0xd7   :  { %v381_v63 = vpop.xlane.xlu0 %380 }
  0xd8   :  { %v382_v0 = vrot.slane %v381_v63, 4 }
  0xda   :  { %v383_v1 = vadd.f32 %v382_v0, %v381_v63 }
  0xdc   :  { %v384_v2 = vrot.slane %v383_v1, 2 }
  0xde   :  { %v385_v47 = vadd.f32 %v384_v2, %v383_v1 }
  0xe0   :  { %v386_v37 = vrot.slane %v385_v47, 1 }
  0xe2   :  { %v387_v10 = vadd.f32 %v386_v37, %v385_v47 }
 0x134   :  { %v336_v3 = vpop.xlane.xlu1 %335 }
 0x135   :  { %v337_v4 = vrot.slane %v336_v3, 4 }
 0x137   :  { %v338_v5 = vadd.f32 %v337_v4, %v336_v3 }
 0x139   :  { %v339_v6 = vrot.slane %v338_v5, 2 }
 0x13b   :  { %v340_v7 = vadd.f32 %v339_v6, %v338_v5 }
 0x13d   :  { %v341_v8 = vrot.slane %v340_v7, 1 }
 0x13f   :  { %v342_v9 = vadd.f32 %v341_v8, %v340_v7 }
 0x141   :  { %409 = vpush %v342_v9 }
 0x142   :  { %411 = vpush %v387_v10 }
 0x172   :  { %s410_s8 = spop %409 }
 0x173   :  { %v390_v40 = vstv %s410_s8  ;;  %s412_s9 = spop %411 }
 0x174   :  { %v391_v11 = vstv %s412_s9 }
 0x175   :  { %v392_v12 = vsel %vm389_vm4, %v390_v40, %v391_v11 }
 0x176   :  { %393 = vst [vmem:[#allocation5] sm:$0xff] %v392_v12 }
 0x177   :  { %451 = shalt.err (!%p448_p12)
}
 0x178   :  { %s452_s13 = scalar_lea.hbm %s660_s3, 128 }
 0x179   :  { %p453_p13 = scmp.ne.s32.totalorder %s660_s3, %s452_s13  ;;  %p456_p0 = scmp.lt.u32.totalorder %s452_s13, %s660_s3 }
 0x17b   :  { %p458_p1 = pnand %p456_p0, %p453_p13 }
 0x17d   :  { %461 = shalt.err (!%p458_p1)
}
 0x17e   :  { %403 = dma.vmem_to_hbm [thread:$0]  %s401_s7, 128, %s660_s3, [#allocation4]  }
 0x17f   :  { %464 = dma.done.wait [#allocation4], 128  }
 0x180   :  { %465 = vsyncadd [#allocation4], 4294967168 }
 0x181   :  { %407 = vsyncpa [#allocation3], 1 }
 0x182   :  { %408 = vsyncpa [#allocation4], 1 }

</bundles_post_ra>
